<compile_context>
chip_gen: v6e
topology: v6e:2x2x1
jax: 0.10.0
libtpu: 0.0.40
codegen_flags: <defaults>
</compile_context>

<pallas_src>
import functools

import jax
import jax.numpy as jnp
import numpy as np
from jax.experimental import pallas as pl
from jax.experimental.pallas import tpu as pltpu

EMBED_DIM = 32
NUM_HEADS = 4
HEAD_DIM = EMBED_DIM // NUM_HEADS
FFN_HIDDEN = 64
SEQ_LEN = 8
BATCH = 2
LN_EPS = 1e-5

# ---- tight packed-weight layout (bf16, (104, 128)) -------------------------------
# rows 0:32   lanes 0:96   wqkv^T, columns permuted to head-grouped [q_h | k_h | v_h]
# rows 0:32   lanes 96:128 wo^T      (concat-of-heads input dim as rows)
# rows 32:64  lanes 32:96  w1^T      (E, F)
# rows 32:96  lanes 0:32   w2^T      (F, E)
# rows 96:104              bias / LayerNorm vectors (one (8,128) tile)
_R_BQKV = EMBED_DIM + FFN_HIDDEN          # 96  (permuted, lanes 0:96)
_R_BO = _R_BQKV + 1                       # 97
_R_B1 = _R_BO + 1                         # 98
_R_B2 = _R_B1 + 1                         # 99
_R_LN1G = _R_B2 + 1                       # 100
_R_LN1B = _R_LN1G + 1                     # 101
_R_LN2G = _R_LN1B + 1                     # 102
_R_LN2B = _R_LN2G + 1                     # 103
_PACK_ROWS = ((_R_LN2B + 1 + 7) // 8) * 8  # 104
_PACK_LANES = 128


def _head_perm():
    """Column permutation mapping [q|k|v] layout -> head-grouped [q_h|k_h|v_h] blocks."""
    E, H, hd = EMBED_DIM, NUM_HEADS, HEAD_DIM
    return np.concatenate([
        np.concatenate([g * E + np.arange(h * hd, (h + 1) * hd) for g in range(3)])
        for h in range(H)
    ])


def _encoder_kernel(x_ref, p_ref, out_ref, *, batch, seq):
    """Whole forward pass in one invocation; bf16 MXU operands, f32 everywhere else."""
    E, H, hd, F = EMBED_DIM, NUM_HEADS, HEAD_DIM, FFN_HIDDEN
    n = batch * seq
    g = H * batch

    x = x_ref[...].astype(jnp.float32)                               # (N, E) f32
    x_bf = x.astype(jnp.bfloat16)

    # bf16 weights straight from the packed buffer (no in-kernel weight casts)
    wqkv = p_ref[0:E, 0:3 * E]                                       # (E, 3E) head-grouped
    wo_h = p_ref[0:E, 3 * E:4 * E].reshape(H, hd, E)                 # (H, hd, E)
    w1 = p_ref[E:2 * E, E:E + F]                                     # (E, F)
    w2 = p_ref[E:E + F, 0:E]                                         # (F, E)
    bqkv = p_ref[_R_BQKV:_R_BQKV + 1, 0:3 * E].astype(jnp.float32)   # (1, 3E) permuted
    bo = p_ref[_R_BO:_R_BO + 1, 0:E].astype(jnp.float32)
    b1 = p_ref[_R_B1:_R_B1 + 1, 0:F].astype(jnp.float32)
    b2 = p_ref[_R_B2:_R_B2 + 1, 0:E].astype(jnp.float32)
    ln1g = p_ref[_R_LN1G:_R_LN1G + 1, 0:E].astype(jnp.float32)
    ln1b = p_ref[_R_LN1B:_R_LN1B + 1, 0:E].astype(jnp.float32)
    ln2g = p_ref[_R_LN2G:_R_LN2G + 1, 0:E].astype(jnp.float32)
    ln2b = p_ref[_R_LN2B:_R_LN2B + 1, 0:E].astype(jnp.float32)

    # --- fused QKV projection: ONE (N,E)@(E,3E) bf16 matmul, f32 accumulate ---
    qkv = jnp.dot(x_bf, wqkv, preferred_element_type=jnp.float32) + bqkv   # (N, 3E) f32

    # --- move heads to the leading dim: columns are already head-grouped, so this is
    #     just H contiguous lane slices + one major-dim concat (g = h*B + b) ---
    blocks = [qkv[:, h * 3 * hd:(h + 1) * 3 * hd].reshape(batch, seq, 3 * hd)
              for h in range(H)]
    qkv_g = jnp.concatenate(blocks, axis=0)                          # (H*B, S, 3hd) f32

    scale = 1.0 / float(np.sqrt(hd))
    q_g = (qkv_g[..., 0:hd] * scale).astype(jnp.bfloat16)            # (G, S, hd)
    k_g = qkv_g[..., hd:2 * hd].astype(jnp.bfloat16)
    v_g = qkv_g[..., 2 * hd:3 * hd].astype(jnp.bfloat16)

    # --- ONE batched score matmul + ONE softmax over all heads & batches ---
    s = jnp.einsum("gqd,gkd->gqk", q_g, k_g, preferred_element_type=jnp.float32)
    s = s - jnp.max(s, axis=-1, keepdims=True)
    e = jnp.exp(s)
    p = e * pl.reciprocal(jnp.sum(e, axis=-1, keepdims=True), approx=True)

    # --- head merge + output projection folded into the value path:
    #     concat_h(P_h V_h) @ Wo == sum_h P_h (V_h Wo_h)  -> two batched dots + a sum ---
    v_hn = v_g.reshape(H, n, hd)                                     # (H, B*S, hd)
    vw = jnp.einsum("hnd,hde->hne", v_hn, wo_h,
                    preferred_element_type=jnp.float32)              # (H, B*S, E)
    vw_g = vw.reshape(g, seq, E).astype(jnp.bfloat16)                # (G, S, E)
    ctx = jnp.einsum("gqk,gke->gqe", p.astype(jnp.bfloat16), vw_g,
                     preferred_element_type=jnp.float32)             # (G, S, E) f32
    attn = jnp.sum(ctx.reshape(H, n, E), axis=0) + bo                # (N, E) f32

    # dropout1 == identity (eval); residual + LayerNorm 1 (all f32)
    x1 = attn + x
    mu1 = jnp.mean(x1, axis=-1, keepdims=True)
    var1 = jnp.mean((x1 - mu1) * (x1 - mu1), axis=-1, keepdims=True)
    x1n = (x1 - mu1) * jax.lax.rsqrt(var1 + LN_EPS) * ln1g + ln1b

    # --- FFN: Linear -> ReLU -> Linear, bf16 operands / f32 accumulation ---
    hmid = jnp.maximum(
        jnp.dot(x1n.astype(jnp.bfloat16), w1, preferred_element_type=jnp.float32) + b1,
        0.0)
    ffn = jnp.dot(hmid.astype(jnp.bfloat16), w2, preferred_element_type=jnp.float32) + b2

    # dropout2 == identity (eval); residual + LayerNorm 2
    x2 = ffn + x1n
    mu2 = jnp.mean(x2, axis=-1, keepdims=True)
    var2 = jnp.mean((x2 - mu2) * (x2 - mu2), axis=-1, keepdims=True)
    x2n = (x2 - mu2) * jax.lax.rsqrt(var2 + LN_EPS) * ln2g + ln2b

    out_ref[...] = x2n.astype(out_ref.dtype)


def _pack_params(params):
    """Pack all weights/biases (pre-transposed, head-permuted QKV) into one bf16 buffer."""
    E, F = EMBED_DIM, FFN_HIDDEN
    perm = _head_perm()
    p = jnp.zeros((_PACK_ROWS, _PACK_LANES), jnp.float32)
    wqkv_t = params["wqkv"].T.astype(jnp.float32)                    # (E, 3E), cols [q|k|v]
    p = p.at[0:E, 0:3 * E].set(wqkv_t[:, perm])                      # head-grouped cols
    p = p.at[0:E, 3 * E:4 * E].set(params["wo"].T.astype(jnp.float32))
    p = p.at[E:2 * E, E:E + F].set(params["w1"].T.astype(jnp.float32))
    p = p.at[E:E + F, 0:E].set(params["w2"].T.astype(jnp.float32))
    p = p.at[_R_BQKV, 0:3 * E].set(params["bqkv"][0].astype(jnp.float32)[perm])
    p = p.at[_R_BO, 0:E].set(params["bo"][0].astype(jnp.float32))
    p = p.at[_R_B1, 0:F].set(params["b1"][0].astype(jnp.float32))
    p = p.at[_R_B2, 0:E].set(params["b2"][0].astype(jnp.float32))
    p = p.at[_R_LN1G, 0:E].set(params["ln1_g"][0].astype(jnp.float32))
    p = p.at[_R_LN1B, 0:E].set(params["ln1_b"][0].astype(jnp.float32))
    p = p.at[_R_LN2G, 0:E].set(params["ln2_g"][0].astype(jnp.float32))
    p = p.at[_R_LN2B, 0:E].set(params["ln2_b"][0].astype(jnp.float32))
    return p.astype(jnp.bfloat16)


@jax.jit
def transformer_encoder_block(x, params):
    """x: (B, S, E).  params: PyTorch-layout weights/biases (biases shaped (1, N))."""
    B, S, E = x.shape
    assert E == EMBED_DIM
    packed = _pack_params(params)            # trace-time prep: transpose + permute + pack
    x2d = x.reshape(B * S, E)                # flatten batch*seq outside the kernel
    kernel = functools.partial(_encoder_kernel, batch=B, seq=S)
    out2d = pl.pallas_call(
        kernel,
        out_shape=jax.ShapeDtypeStruct((B * S, E), x.dtype),
        in_specs=[pl.BlockSpec(memory_space=pltpu.MemorySpace.VMEM),
                  pl.BlockSpec(memory_space=pltpu.MemorySpace.VMEM)],
        out_specs=pl.BlockSpec(memory_space=pltpu.MemorySpace.VMEM),
    )(x2d, packed)
    return out2d.reshape(B, S, E)


def _reference(x, params):
    """Pure-JAX f32 reference of the same forward pass (for correctness check)."""
    x = x.astype(jnp.float32)
    E = x.shape[-1]
    hd = E // NUM_HEADS
    qkv = jnp.einsum("bse,fe->bsf", x, params["wqkv"]) + params["bqkv"][0]
    q, k, v = qkv[..., :E], qkv[..., E:2 * E], qkv[..., 2 * E:]

    def split(a):  # (B,S,E) -> (B,H,S,hd)
        B, S, _ = a.shape
        return a.reshape(B, S, NUM_HEADS, hd).transpose(0, 2, 1, 3)

    qh, kh, vh = split(q), split(k), split(v)
    s = jnp.einsum("bhqd,bhkd->bhqk", qh, kh) / jnp.sqrt(hd)
    p = jax.nn.softmax(s, axis=-1)
    o = jnp.einsum("bhqk,bhkd->bhqd", p, vh)
    o = o.transpose(0, 2, 1, 3).reshape(x.shape)
    attn = jnp.einsum("bse,fe->bsf", o, params["wo"]) + params["bo"][0]

    def ln(a, g, b):
        mu = jnp.mean(a, axis=-1, keepdims=True)
        var = jnp.mean((a - mu) ** 2, axis=-1, keepdims=True)
        return (a - mu) / jnp.sqrt(var + LN_EPS) * g[0] + b[0]

    x1 = ln(attn + x, params["ln1_g"], params["ln1_b"])
    h = jax.nn.relu(jnp.einsum("bse,fe->bsf", x1, params["w1"]) + params["b1"][0])
    f = jnp.einsum("bsf,ef->bse", h, params["w2"]) + params["b2"][0]
    return ln(f + x1, params["ln2_g"], params["ln2_b"])


def make_params(key, embed_dim, num_heads, ffn_hidden):
    ks = jax.random.split(key, 8)
    s = 0.02
    return {
        "wqkv": jax.random.normal(ks[0], (3 * embed_dim, embed_dim), jnp.float32) * s,
        "bqkv": jax.random.normal(ks[1], (1, 3 * embed_dim), jnp.float32) * s,
        "wo": jax.random.normal(ks[2], (embed_dim, embed_dim), jnp.float32) * s,
        "bo": jax.random.normal(ks[3], (1, embed_dim), jnp.float32) * s,
        "w1": jax.random.normal(ks[4], (ffn_hidden, embed_dim), jnp.float32) * s,
        "b1": jax.random.normal(ks[5], (1, ffn_hidden), jnp.float32) * s,
        "w2": jax.random.normal(ks[6], (embed_dim, ffn_hidden), jnp.float32) * s,
        "b2": jax.random.normal(ks[7], (1, embed_dim), jnp.float32) * s,
        "ln1_g": jnp.ones((1, embed_dim), jnp.float32),
        "ln1_b": jnp.zeros((1, embed_dim), jnp.float32),
        "ln2_g": jnp.ones((1, embed_dim), jnp.float32),
        "ln2_b": jnp.zeros((1, embed_dim), jnp.float32),
    }


if __name__ == "__main__":
    key = jax.random.PRNGKey(0)
    kx, kp = jax.random.split(key)
    x = jax.random.normal(kx, (BATCH, SEQ_LEN, EMBED_DIM), jnp.float32)
    params = make_params(kp, EMBED_DIM, NUM_HEADS, FFN_HIDDEN)

    out = transformer_encoder_block(x, params)
    out = jax.block_until_ready(out)

    ref = _reference(x, params)
    # tolerance accounts for bf16 MXU operands + approx (EUP) softmax reciprocal
    np.testing.assert_allclose(np.asarray(out), np.asarray(ref), atol=5e-3, rtol=5e-3)

    print("KERNEL_OK")
</pallas_src>

<mosaic_0001>
module attributes {stable_mosaic.version = 11 : i64} {
  func.func @_encoder_kernel(%arg0: memref<16x32xf32, #tpu.memory_space<vmem>>, %arg1: memref<104x128xbf16, #tpu.memory_space<vmem>>, %arg2: memref<16x32xf32, #tpu.memory_space<vmem>>) attributes {dimension_semantics = [], scalar_prefetch = 0 : i64, scratch_operands = 0 : i64, tpu.core_type = #tpu.core_type<tc>} {
    %c0 = arith.constant 0 : index
    %c0_0 = arith.constant 0 : index
    %0 = vector.load %arg0[%c0, %c0_0] : memref<16x32xf32, #tpu.memory_space<vmem>>, vector<16x32xf32>
    %1 = arith.truncf %0 : vector<16x32xf32> to vector<16x32xbf16>
    %c0_1 = arith.constant 0 : index
    %c0_2 = arith.constant 0 : index
    %2 = vector.load %arg1[%c0_1, %c0_2] : memref<104x128xbf16, #tpu.memory_space<vmem>>, vector<32x96xbf16>
    %c0_3 = arith.constant 0 : index
    %c96 = arith.constant 96 : index
    %3 = vector.load %arg1[%c0_3, %c96] : memref<104x128xbf16, #tpu.memory_space<vmem>>, vector<32x32xbf16>
    %4 = vector.shape_cast %3 : vector<32x32xbf16> to vector<4x8x32xbf16>
    %c32 = arith.constant 32 : index
    %c32_4 = arith.constant 32 : index
    %5 = vector.load %arg1[%c32, %c32_4] : memref<104x128xbf16, #tpu.memory_space<vmem>>, vector<32x64xbf16>
    %c32_5 = arith.constant 32 : index
    %c0_6 = arith.constant 0 : index
    %6 = vector.load %arg1[%c32_5, %c0_6] : memref<104x128xbf16, #tpu.memory_space<vmem>>, vector<64x32xbf16>
    %c96_7 = arith.constant 96 : index
    %c0_8 = arith.constant 0 : index
    %7 = vector.load %arg1[%c96_7, %c0_8] : memref<104x128xbf16, #tpu.memory_space<vmem>>, vector<1x96xbf16>
    %8 = arith.extf %7 : vector<1x96xbf16> to vector<1x96xf32>
    %c97 = arith.constant 97 : index
    %c0_9 = arith.constant 0 : index
    %9 = vector.load %arg1[%c97, %c0_9] : memref<104x128xbf16, #tpu.memory_space<vmem>>, vector<1x32xbf16>
    %10 = arith.extf %9 : vector<1x32xbf16> to vector<1x32xf32>
    %c98 = arith.constant 98 : index
    %c0_10 = arith.constant 0 : index
    %11 = vector.load %arg1[%c98, %c0_10] : memref<104x128xbf16, #tpu.memory_space<vmem>>, vector<1x64xbf16>
    %12 = arith.extf %11 : vector<1x64xbf16> to vector<1x64xf32>
    %c99 = arith.constant 99 : index
    %c0_11 = arith.constant 0 : index
    %13 = vector.load %arg1[%c99, %c0_11] : memref<104x128xbf16, #tpu.memory_space<vmem>>, vector<1x32xbf16>
    %14 = arith.extf %13 : vector<1x32xbf16> to vector<1x32xf32>
    %c100 = arith.constant 100 : index
    %c0_12 = arith.constant 0 : index
    %15 = vector.load %arg1[%c100, %c0_12] : memref<104x128xbf16, #tpu.memory_space<vmem>>, vector<1x32xbf16>
    %16 = arith.extf %15 : vector<1x32xbf16> to vector<1x32xf32>
    %c101 = arith.constant 101 : index
    %c0_13 = arith.constant 0 : index
    %17 = vector.load %arg1[%c101, %c0_13] : memref<104x128xbf16, #tpu.memory_space<vmem>>, vector<1x32xbf16>
    %18 = arith.extf %17 : vector<1x32xbf16> to vector<1x32xf32>
    %c102 = arith.constant 102 : index
    %c0_14 = arith.constant 0 : index
    %19 = vector.load %arg1[%c102, %c0_14] : memref<104x128xbf16, #tpu.memory_space<vmem>>, vector<1x32xbf16>
    %20 = arith.extf %19 : vector<1x32xbf16> to vector<1x32xf32>
    %c103 = arith.constant 103 : index
    %c0_15 = arith.constant 0 : index
    %21 = vector.load %arg1[%c103, %c0_15] : memref<104x128xbf16, #tpu.memory_space<vmem>>, vector<1x32xbf16>
    %22 = arith.extf %21 : vector<1x32xbf16> to vector<1x32xf32>
    %cst = arith.constant dense<0.000000e+00> : vector<16x96xf32>
    %23 = tpu.matmul %1, %2, %cst {dimension_numbers = #tpu.dot_dimension_numbers<[1], [0], [0], [1], [0, 0, 1, 1], [], []>} : vector<16x32xbf16>, vector<32x96xbf16>, vector<16x96xf32> -> vector<16x96xf32>
    %24 = vector.broadcast %8 : vector<1x96xf32> to vector<16x96xf32>
    %25 = arith.addf %23, %24 : vector<16x96xf32>
    %26 = vector.extract_strided_slice %25 {offsets = [0, 0], sizes = [16, 24], strides = [1, 1]} : vector<16x96xf32> to vector<16x24xf32>
    %27 = vector.shape_cast %26 : vector<16x24xf32> to vector<2x8x24xf32>
    %28 = vector.extract_strided_slice %25 {offsets = [0, 24], sizes = [16, 24], strides = [1, 1]} : vector<16x96xf32> to vector<16x24xf32>
    %29 = vector.shape_cast %28 : vector<16x24xf32> to vector<2x8x24xf32>
    %30 = vector.extract_strided_slice %25 {offsets = [0, 48], sizes = [16, 24], strides = [1, 1]} : vector<16x96xf32> to vector<16x24xf32>
    %31 = vector.shape_cast %30 : vector<16x24xf32> to vector<2x8x24xf32>
    %32 = vector.extract_strided_slice %25 {offsets = [0, 72], sizes = [16, 24], strides = [1, 1]} : vector<16x96xf32> to vector<16x24xf32>
    %33 = vector.shape_cast %32 : vector<16x24xf32> to vector<2x8x24xf32>
    %34 = tpu.concatenate %27, %29, %31, %33 in 0 : vector<2x8x24xf32>, vector<2x8x24xf32>, vector<2x8x24xf32>, vector<2x8x24xf32> -> vector<8x8x24xf32>
    %35 = vector.extract_strided_slice %34 {offsets = [0, 0, 0], sizes = [8, 8, 8], strides = [1, 1, 1]} : vector<8x8x24xf32> to vector<8x8x8xf32>
    %cst_16 = arith.constant 0.353553385 : f32
    %36 = vector.broadcast %cst_16 : f32 to vector<8x8x8xf32>
    %37 = arith.mulf %35, %36 : vector<8x8x8xf32>
    %38 = arith.truncf %37 : vector<8x8x8xf32> to vector<8x8x8xbf16>
    %39 = vector.extract_strided_slice %34 {offsets = [0, 0, 8], sizes = [8, 8, 8], strides = [1, 1, 1]} : vector<8x8x24xf32> to vector<8x8x8xf32>
    %40 = arith.truncf %39 : vector<8x8x8xf32> to vector<8x8x8xbf16>
    %41 = vector.extract_strided_slice %34 {offsets = [0, 0, 16], sizes = [8, 8, 8], strides = [1, 1, 1]} : vector<8x8x24xf32> to vector<8x8x8xf32>
    %42 = arith.truncf %41 : vector<8x8x8xf32> to vector<8x8x8xbf16>
    "tpu.trace_start"() <{level = 10 : i32, message = "gqd,gkd->gqk"}> : () -> ()
    %cst_17 = arith.constant dense<0.000000e+00> : vector<8x8x8xf32>
    %43 = tpu.matmul %38, %40, %cst_17 {dimension_numbers = #tpu.dot_dimension_numbers<[2], [2], [1], [1], [0, 0, 0, 1, 1, 1], [0], [0]>} : vector<8x8x8xbf16>, vector<8x8x8xbf16>, vector<8x8x8xf32> -> vector<8x8x8xf32>
    "tpu.trace_stop"() : () -> ()
    %cst_18 = arith.constant dense<0xFF800000> : vector<8x8xf32>
    %44 = vector.multi_reduction <maximumf>, %43, %cst_18 [2] : vector<8x8x8xf32> to vector<8x8xf32>
    %45 = vector.shape_cast %44 : vector<8x8xf32> to vector<8x8x1xf32>
    %46 = vector.broadcast %45 : vector<8x8x1xf32> to vector<8x8x8xf32>
    %47 = arith.subf %43, %46 : vector<8x8x8xf32>
    %48 = math.exp %47 : vector<8x8x8xf32>
    %cst_19 = arith.constant dense<0.000000e+00> : vector<8x8xf32>
    %49 = vector.multi_reduction <add>, %48, %cst_19 [2] : vector<8x8x8xf32> to vector<8x8xf32>
    %50 = vector.shape_cast %49 : vector<8x8xf32> to vector<8x8x1xf32>
    %51 = tpu.reciprocal %50 {approx = true} : vector<8x8x1xf32> -> vector<8x8x1xf32>
    %52 = vector.broadcast %51 : vector<8x8x1xf32> to vector<8x8x8xf32>
    %53 = arith.mulf %48, %52 : vector<8x8x8xf32>
    %54 = vector.shape_cast %42 : vector<8x8x8xbf16> to vector<4x16x8xbf16>
    "tpu.trace_start"() <{level = 10 : i32, message = "hnd,hde->hne"}> : () -> ()
    %cst_20 = arith.constant dense<0.000000e+00> : vector<4x16x32xf32>
    %55 = tpu.matmul %54, %4, %cst_20 {dimension_numbers = #tpu.dot_dimension_numbers<[2], [1], [1], [2], [0, 0, 0, 1, 1, 2], [0], [0]>} : vector<4x16x8xbf16>, vector<4x8x32xbf16>, vector<4x16x32xf32> -> vector<4x16x32xf32>
    "tpu.trace_stop"() : () -> ()
    %56 = vector.shape_cast %55 : vector<4x16x32xf32> to vector<8x8x32xf32>
    %57 = arith.truncf %56 : vector<8x8x32xf32> to vector<8x8x32xbf16>
    %58 = arith.truncf %53 : vector<8x8x8xf32> to vector<8x8x8xbf16>
    "tpu.trace_start"() <{level = 10 : i32, message = "gqk,gke->gqe"}> : () -> ()
    %cst_21 = arith.constant dense<0.000000e+00> : vector<8x8x32xf32>
    %59 = tpu.matmul %58, %57, %cst_21 {dimension_numbers = #tpu.dot_dimension_numbers<[2], [1], [1], [2], [0, 0, 0, 1, 1, 2], [0], [0]>} : vector<8x8x8xbf16>, vector<8x8x32xbf16>, vector<8x8x32xf32> -> vector<8x8x32xf32>
    "tpu.trace_stop"() : () -> ()
    %60 = vector.shape_cast %59 : vector<8x8x32xf32> to vector<4x16x32xf32>
    %cst_22 = arith.constant dense<0.000000e+00> : vector<16x32xf32>
    %61 = vector.multi_reduction <add>, %60, %cst_22 [0] : vector<4x16x32xf32> to vector<16x32xf32>
    %62 = vector.broadcast %10 : vector<1x32xf32> to vector<16x32xf32>
    %63 = arith.addf %61, %62 : vector<16x32xf32>
    %64 = arith.addf %63, %0 : vector<16x32xf32>
    %cst_23 = arith.constant dense<0.000000e+00> : vector<16xf32>
    %65 = vector.multi_reduction <add>, %64, %cst_23 [1] : vector<16x32xf32> to vector<16xf32>
    %66 = vector.shape_cast %65 : vector<16xf32> to vector<16x1xf32>
    %cst_24 = arith.constant 3.200000e+01 : f32
    %67 = vector.broadcast %cst_24 : f32 to vector<16x1xf32>
    %68 = arith.divf %66, %67 : vector<16x1xf32>
    %69 = vector.broadcast %68 : vector<16x1xf32> to vector<16x32xf32>
    %70 = arith.subf %64, %69 : vector<16x32xf32>
    %71 = vector.broadcast %68 : vector<16x1xf32> to vector<16x32xf32>
    %72 = arith.subf %64, %71 : vector<16x32xf32>
    %73 = arith.mulf %70, %72 : vector<16x32xf32>
    %cst_25 = arith.constant dense<0.000000e+00> : vector<16xf32>
    %74 = vector.multi_reduction <add>, %73, %cst_25 [1] : vector<16x32xf32> to vector<16xf32>
    %75 = vector.shape_cast %74 : vector<16xf32> to vector<16x1xf32>
    %cst_26 = arith.constant 3.200000e+01 : f32
    %76 = vector.broadcast %cst_26 : f32 to vector<16x1xf32>
    %77 = arith.divf %75, %76 : vector<16x1xf32>
    %78 = vector.broadcast %68 : vector<16x1xf32> to vector<16x32xf32>
    %79 = arith.subf %64, %78 : vector<16x32xf32>
    %cst_27 = arith.constant 9.99999974E-6 : f32
    %80 = vector.broadcast %cst_27 : f32 to vector<16x1xf32>
    %81 = arith.addf %77, %80 : vector<16x1xf32>
    %82 = math.rsqrt %81 : vector<16x1xf32>
    %83 = vector.broadcast %82 : vector<16x1xf32> to vector<16x32xf32>
    %84 = arith.mulf %79, %83 : vector<16x32xf32>
    %85 = vector.broadcast %16 : vector<1x32xf32> to vector<16x32xf32>
    %86 = arith.mulf %84, %85 : vector<16x32xf32>
    %87 = vector.broadcast %18 : vector<1x32xf32> to vector<16x32xf32>
    %88 = arith.addf %86, %87 : vector<16x32xf32>
    %89 = arith.truncf %88 : vector<16x32xf32> to vector<16x32xbf16>
    %cst_28 = arith.constant dense<0.000000e+00> : vector<16x64xf32>
    %90 = tpu.matmul %89, %5, %cst_28 {dimension_numbers = #tpu.dot_dimension_numbers<[1], [0], [0], [1], [0, 0, 1, 1], [], []>} : vector<16x32xbf16>, vector<32x64xbf16>, vector<16x64xf32> -> vector<16x64xf32>
    %91 = vector.broadcast %12 : vector<1x64xf32> to vector<16x64xf32>
    %92 = arith.addf %90, %91 : vector<16x64xf32>
    %cst_29 = arith.constant 0.000000e+00 : f32
    %93 = vector.broadcast %cst_29 : f32 to vector<16x64xf32>
    %94 = arith.maximumf %92, %93 : vector<16x64xf32>
    %95 = arith.truncf %94 : vector<16x64xf32> to vector<16x64xbf16>
    %cst_30 = arith.constant dense<0.000000e+00> : vector<16x32xf32>
    %96 = tpu.matmul %95, %6, %cst_30 {dimension_numbers = #tpu.dot_dimension_numbers<[1], [0], [0], [1], [0, 0, 1, 1], [], []>} : vector<16x64xbf16>, vector<64x32xbf16>, vector<16x32xf32> -> vector<16x32xf32>
    %97 = vector.broadcast %14 : vector<1x32xf32> to vector<16x32xf32>
    %98 = arith.addf %96, %97 : vector<16x32xf32>
    %99 = arith.addf %98, %88 : vector<16x32xf32>
    %cst_31 = arith.constant dense<0.000000e+00> : vector<16xf32>
    %100 = vector.multi_reduction <add>, %99, %cst_31 [1] : vector<16x32xf32> to vector<16xf32>
    %101 = vector.shape_cast %100 : vector<16xf32> to vector<16x1xf32>
    %cst_32 = arith.constant 3.200000e+01 : f32
    %102 = vector.broadcast %cst_32 : f32 to vector<16x1xf32>
    %103 = arith.divf %101, %102 : vector<16x1xf32>
    %104 = vector.broadcast %103 : vector<16x1xf32> to vector<16x32xf32>
    %105 = arith.subf %99, %104 : vector<16x32xf32>
    %106 = vector.broadcast %103 : vector<16x1xf32> to vector<16x32xf32>
    %107 = arith.subf %99, %106 : vector<16x32xf32>
    %108 = arith.mulf %105, %107 : vector<16x32xf32>
    %cst_33 = arith.constant dense<0.000000e+00> : vector<16xf32>
    %109 = vector.multi_reduction <add>, %108, %cst_33 [1] : vector<16x32xf32> to vector<16xf32>
    %110 = vector.shape_cast %109 : vector<16xf32> to vector<16x1xf32>
    %cst_34 = arith.constant 3.200000e+01 : f32
    %111 = vector.broadcast %cst_34 : f32 to vector<16x1xf32>
    %112 = arith.divf %110, %111 : vector<16x1xf32>
    %113 = vector.broadcast %103 : vector<16x1xf32> to vector<16x32xf32>
    %114 = arith.subf %99, %113 : vector<16x32xf32>
    %cst_35 = arith.constant 9.99999974E-6 : f32
    %115 = vector.broadcast %cst_35 : f32 to vector<16x1xf32>
    %116 = arith.addf %112, %115 : vector<16x1xf32>
    %117 = math.rsqrt %116 : vector<16x1xf32>
    %118 = vector.broadcast %117 : vector<16x1xf32> to vector<16x32xf32>
    %119 = arith.mulf %114, %118 : vector<16x32xf32>
    %120 = vector.broadcast %20 : vector<1x32xf32> to vector<16x32xf32>
    %121 = arith.mulf %119, %120 : vector<16x32xf32>
    %122 = vector.broadcast %22 : vector<1x32xf32> to vector<16x32xf32>
    %123 = arith.addf %121, %122 : vector<16x32xf32>
    %c0_36 = arith.constant 0 : index
    %c0_37 = arith.constant 0 : index
    %124 = vector.load %arg2[%c0_36, %c0_37] : memref<16x32xf32, #tpu.memory_space<vmem>>, vector<16x32xf32>
    tpu.vector_store %arg2[%c0_36, %c0_37], %123 {strides = array<i32>} : memref<16x32xf32, #tpu.memory_space<vmem>>, vector<16x32xf32>,
    return
  }
}

</mosaic_0001>

<bundles_post_ra>
// kernel: transformer_encoder_block.1
= control target key start
LH: loop header
LB: loop body
LE: loop exit
PB: predicated region body
PF: predicated region fallthrough
CT: control target
= control target key end

     0   :  { %v1801_v2 = vmov 0.0   ;;  %vm1802_vm0 = vmmov 0   ;;  %s2168_s0 = inlined_call_operand.vmem [shape: f32[16,32], index: 0, kind: input, shape index: {}]   ;;  %s2169_s1 = inlined_call_operand.vmem [shape: bf16[104,128], index: 1, kind: input, shape index: {}]   ;;  %s2170_s2 = inlined_call_operand.hbm [shape: f32[16,32], index: 2, kind: output, shape index: {}]  }
   0x1   :  { %v1831_v0 = vld [vmem:[%s2169_s1 + $0x8] sm:$0xf]  ;;  %v1836_v1 = vld [vmem:[%s2169_s1 + $0xc] sm:$0xf]  ;;  %1569 = vmatprep.subr.bf16.mxu1 %v1801_v2  ;;  %v1844_v4 = vld [vmem:[%s2169_s1] sm:$0xf]  ;;  %1573 = vmatprep.mubr.msk.bf16.mxu1 %vm1802_vm0, %v1801_v2 }
   0x2   :  { %v1478_v3 = vcombine.low %v1831_v0, %v1836_v1  ;;  %v1849_v5 = vld [vmem:[%s2169_s1 + $0x4] sm:$0xf]  ;;  %v1861_v7 = vld [vmem:[%s2168_s0 + $0x8] sm:$0xff]  ;;  %1583 = vmatprep.subr.bf16.mxu0 %v1801_v2  ;;  %1585 = vmatprep.mubr.msk.bf16.mxu0 %vm1802_vm0, %v1801_v2 }
   0x3   :  { %v1856_v6 = vld [vmem:[%s2168_s0] sm:$0xff]  ;;  %v1477_v8 = vcombine.low %v1844_v4, %v1849_v5 }
   0x4   :  { %1570 = vmatpush3.bf16.msra.mxu1 %v1478_v3 }
   0x5   :  { %1571 = vmatprep.subr.bf16.mxu1 %v1801_v2 }
   0x6   :  { %7 = vsyncpa [#allocation3], 0  ;;  %v15_v9 = vpack.c.bf16 %v1861_v7, %v1856_v6  ;;  %vm52_vm1 = vcmask 261120   ;;  %v36_v10 = vlaneseq  ;;  %v1880_v12 = vld [vmem:[%s2169_s1 + $0x30] sm:$0x1]  ;;  %s1803_s22 = smov 80   ;;  %v1489_v36 = vcombine.low %v1844_v4, %v1844_v4 }
   0x7   :  { %v29_v13 = vunpack.c.l.bf16 %v1880_v12  ;;  %s1804_s23 = smov 104   ;;  %s1805_s24 = smov 56   ;;  %vm144_vm2 = vcmask 64512   ;;  %v1492_v44 = vcombine.low %v1849_v5, %v1849_v5  ;;  %v1495_v45 = vcombine.low %v1831_v0, %v1831_v0 }
   0x8   :  { %1572 = vmatpush3.bf16.msra.mxu1 %v1477_v8  ;;  %v1875_v11 = vshrl.u32 %v36_v10, 7  ;;  %s1806_s25 = smov 120   ;;  %s1807_s26 = smov 32   ;;  %v1498_v49 = vcombine.low %v1836_v1, %v1836_v1  ;;  %vm633_vm3 = vcmask 1043456   ;;  %vm1374_vm4 = vcmask 523264  }
   0x9   :  { %1577 = vmatprep.subr.bf16.mxu1 %v1801_v2  ;;  %s1808_s27 = smov 112   ;;  %s1809_s30 = smov 96  }
   0xa   :  { %v38_v14 = vsub.s32 0, %v1875_v11  ;;  %s1810_s15 = smov [#allocation2]  }
   0xb   :  { %1574 = vmatmul.mubr.msk.bf16.vlgmr.msra.gmra.mxu1 %vm52_vm1, %v15_v9  ;;  %s1466_s16 = sshll.u32 %s1810_s15, 4  ;;  %s1467_s16 = int_to_ptr.vmem [resolvable:$true] %s1466_s16 }
   0xc   :  { %1579 = vmatprep.mubr.msk.bf16.mxu1 %vm1802_vm0, %v1801_v2  ;;  %v39_v15 = vrot.slane %v29_v13, %v38_v14  ;;  %p1784_p1 = scmp.lt.s32.totalorder %s1467_s16, %s1467_s16 }
  0xcb   :  { %v90_v16 = vpop.f32.mrf.mxu1 }
  0xcc   :  { %v91_v17 = vadd.f32 %v90_v16, %v39_v15 }
  0xcd   :  { %v1575_v18 = vpop.f32.mrf.mxu1 }
  0xce   :  { %105 = vrot.lane.b32.xlu1 %v91_v17, %s1803_s22  ;;  %99 = vrot.lane.b32.xlu0 %v91_v17, %s1804_s23  ;;  %v133_v23 = vpack.c.bf16 %v91_v17, %v91_v17  ;;  %v117_v42 = vmul.f32 0.35355338, %v91_v17 }
  0xcf   :  { %v93_v19 = vpop.f32.mrf.mxu1 }
  0xd0   :  { %v94_v20 = vadd.f32 %v93_v19, %v39_v15  ;;  %v125_v46 = vpack.c.bf16 %v117_v42, %v117_v42 }
  0xd1   :  { %v1576_v21 = vpop.f32.mrf.mxu1 }
  0xd2   :  { %107 = vrot.lane.b32.xlu1 %v94_v20, %s1803_s22  ;;  %101 = vrot.lane.b32.xlu0 %v94_v20, %s1804_s23  ;;  %v1514_v22 = vpack.c.bf16 %v94_v20, %v91_v17  ;;  %v134_v24 = vpack.c.bf16 %v94_v20, %v94_v20  ;;  %v118_v43 = vmul.f32 0.35355338, %v94_v20 }
  0xd4   :  { %v126_v47 = vpack.c.bf16 %v118_v43, %v118_v43 }
  0xd6   :  { %113 = vrot.lane.b32.xlu1 %v94_v20, %s1805_s24  ;;  %111 = vrot.lane.b32.xlu0 %v91_v17, %s1805_s24 }
  0xda   :  { %142 = vrot.lane.b32.xlu0 %v133_v23, %s1806_s25  ;;  %192 = vrot.lane.b32.xlu1 %v134_v24, %s1806_s25 }
 0x140   :  { %v1888_v25 = vpop.permute.xlu1 %105  ;;  %v100_v26 = vpop.permute.xlu0 %99 }
 0x141   :  { %v135_v27 = vpack.c.bf16 %v100_v26, %v100_v26  ;;  %v137_v30 = vpack.c.bf16 %v1888_v25, %v1888_v25  ;;  %v119_v54 = vmul.f32 0.35355338, %v100_v26  ;;  %v121_v61 = vmul.f32 0.35355338, %v1888_v25 }
 0x143   :  { %241 = vrot.lane.b32.xlu0 %v135_v27, %s1806_s25  ;;  %v127_v58 = vpack.c.bf16 %v119_v54, %v119_v54  ;;  %v129_v3 = vpack.c.bf16 %v121_v61, %v121_v61 }
 0x144   :  { %v1891_v28 = vpop.permute.xlu1 %107  ;;  %v102_v29 = vpop.permute.xlu0 %101 }
 0x145   :  { %v136_v31 = vpack.c.bf16 %v102_v29, %v102_v29  ;;  %v138_v35 = vpack.c.bf16 %v1891_v28, %v1891_v28  ;;  %v1515_v48 = vpack.c.bf16 %v102_v29, %v100_v26  ;;  %v1516_v50 = vpack.c.bf16 %v1891_v28, %v1888_v25 }
 0x146   :  { %v120_v59 = vmul.f32 0.35355338, %v102_v29  ;;  %v122_v5 = vmul.f32 0.35355338, %v1891_v28 }
 0x147   :  { %339 = vrot.lane.b32.xlu0 %v137_v30, %s1806_s25  ;;  %290 = vrot.lane.b32.xlu1 %v136_v31, %s1806_s25 }
 0x148   :  { %v1897_v32 = vpop.permute.xlu1 %113  ;;  %v1899_v33 = vpop.permute.xlu0 %111  ;;  %v128_v0 = vpack.c.bf16 %v120_v59, %v120_v59  ;;  %v130_v14 = vpack.c.bf16 %v122_v5, %v122_v5 }
 0x149   :  { %v139_v34 = vpack.c.bf16 %v1899_v33, %v1899_v33  ;;  %v140_v41 = vpack.c.bf16 %v1897_v32, %v1897_v32  ;;  %v1517_v51 = vpack.c.bf16 %v1897_v32, %v1899_v33  ;;  %v123_v9 = vmul.f32 0.35355338, %v1899_v33 }
 0x14a   :  { %v124_v19 = vmul.f32 0.35355338, %v1897_v32 }
 0x14b   :  { %437 = vrot.lane.b32.xlu0 %v139_v34, %s1806_s25  ;;  %388 = vrot.lane.b32.xlu1 %v138_v35, %s1806_s25  ;;  %v131_v17 = vpack.c.bf16 %v123_v9, %v123_v9 }
 0x14c   :  { %v143_v37 = vpop.permute.xlu0 %142  ;;  %v193_v38 = vpop.permute.xlu1 %192 }
 0x14d   :  { %v149_v39 = vsel %vm144_vm2, %v143_v37, 0  ;;  %v198_v40 = vsel %vm144_vm2, %v193_v38, 0 }
 0x14e   :  { %1578 = vmatpush3.bf16.xpose.msra.mxu1 %v149_v39  ;;  %1584 = vmatpush3.bf16.xpose.msra.mxu0 %v198_v40 }
 0x14f   :  { %628 = vrot.lane.b32.xlu0 %v1489_v36, %s1807_s26  ;;  %1589 = vmatprep.subr.bf16.mxu1 %v1801_v2 }
 0x150   :  { %486 = vrot.lane.b32.xlu1 %v140_v41, %s1806_s25  ;;  %1595 = vmatprep.subr.bf16.mxu0 %v1801_v2 }
 0x153   :  { %684 = vrot.lane.b32.xlu0 %v1492_v44, %s1807_s26 }
 0x154   :  { %625 = vrot.lane.b32.xlu1 %v1514_v22, %s1808_s27  ;;  %v132_v22 = vpack.c.bf16 %v124_v19, %v124_v19 }
 0x155   :  { %1580 = vmatmul.mubr.msk.bf16.vlgmr.msra.gmra.mxu1 %vm144_vm2, %v125_v46  ;;  %1586 = vmatmul.mubr.msk.bf16.vlgmr.msra.gmra.mxu0 %vm144_vm2, %v126_v47 }
 0x156   :  { %1591 = vmatprep.mubr.msk.bf16.mxu1 %vm1802_vm0, %v1801_v2  ;;  %1597 = vmatprep.mubr.msk.bf16.mxu0 %vm1802_vm0, %v1801_v2 }
 0x157   :  { %739 = vrot.lane.b32.xlu0 %v1495_v45, %s1807_s26 }
 0x158   :  { %681 = vrot.lane.b32.xlu1 %v1515_v48, %s1808_s27 }
 0x15b   :  { %794 = vrot.lane.b32.xlu0 %v1498_v49, %s1807_s26 }
 0x15c   :  { %736 = vrot.lane.b32.xlu1 %v1516_v50, %s1808_s27 }
 0x160   :  { %791 = vrot.lane.b32.xlu1 %v1517_v51, %s1808_s27 }
 0x1b5   :  { %v242_v52 = vpop.permute.xlu0 %241 }
 0x1b6   :  { %v247_v53 = vsel %vm144_vm2, %v242_v52, 0 }
 0x1b7   :  { %1590 = vmatpush3.bf16.xpose.msra.mxu1 %v247_v53 }
 0x1b8   :  { %1601 = vmatprep.subr.bf16.mxu1 %v1801_v2 }
 0x1b9   :  { %v340_v55 = vpop.permute.xlu0 %339  ;;  %v291_v56 = vpop.permute.xlu1 %290 }
 0x1ba   :  { %v296_v57 = vsel %vm144_vm2, %v291_v56, 0  ;;  %v345_v60 = vsel %vm144_vm2, %v340_v55, 0 }
 0x1bb   :  { %1596 = vmatpush3.bf16.xpose.msra.mxu0 %v296_v57 }
 0x1bc   :  { %1607 = vmatprep.subr.bf16.mxu0 %v1801_v2 }
 0x1bd   :  { %v438_v62 = vpop.permute.xlu0 %437  ;;  %v389_v63 = vpop.permute.xlu1 %388 }
 0x1be   :  { %1592 = vmatmul.mubr.msk.bf16.vlgmr.msra.gmra.mxu1 %vm144_vm2, %v127_v58  ;;  %v394_v1 = vsel %vm144_vm2, %v389_v63, 0  ;;  %v443_v8 = vsel %vm144_vm2, %v438_v62, 0 }
 0x1bf   :  { %1602 = vmatpush3.bf16.xpose.msra.mxu1 %v345_v60  ;;  %1603 = vmatprep.mubr.msk.bf16.mxu1 %vm1802_vm0, %v1801_v2 }
 0x1c0   :  { %1613 = vmatprep.subr.bf16.mxu1 %v1801_v2 }
 0x1c1   :  { %v629_v4 = vpop.permute.xlu0 %628 }
 0x1c2   :  { %1598 = vmatmul.mubr.msk.bf16.vlgmr.msra.gmra.mxu0 %vm144_vm2, %v128_v0  ;;  %v487_v10 = vpop.permute.xlu1 %486  ;;  %v635_v18 = vsel %vm633_vm3, %v629_v4, 0 }
 0x1c3   :  { %1608 = vmatpush3.bf16.xpose.msra.mxu0 %v394_v1  ;;  %1609 = vmatprep.mubr.msk.bf16.mxu0 %vm1802_vm0, %v1801_v2  ;;  %v492_v16 = vsel %vm144_vm2, %v487_v10, 0 }
 0x1c4   :  { %1619 = vmatprep.subr.bf16.mxu0 %v1801_v2 }
 0x1c5   :  { %v685_v15 = vpop.permute.xlu0 %684 }
 0x1c6   :  { %1604 = vmatmul.mubr.msk.bf16.vlgmr.msra.gmra.mxu1 %vm144_vm2, %v129_v3  ;;  %v626_v20 = vpop.permute.xlu1 %625  ;;  %v690_v23 = vsel %vm633_vm3, %v685_v15, 0 }
 0x1c7   :  { %1614 = vmatpush3.bf16.xpose.msra.mxu1 %v443_v8  ;;  %1615 = vmatprep.mubr.msk.bf16.mxu1 %vm1802_vm0, %v1801_v2 }
 0x1c8   :  { %1625 = vmatprep.subr.bf16.mxu1 %v1801_v2 }
 0x1c9   :  { %v740_v21 = vpop.permute.xlu0 %739 }
 0x1ca   :  { %1610 = vmatmul.mubr.msk.bf16.vlgmr.msra.gmra.mxu0 %vm144_vm2, %v130_v14  ;;  %v745_v24 = vsel %vm633_vm3, %v740_v21, 0  ;;  %v682_v25 = vpop.permute.xlu1 %681 }
 0x1cb   :  { %1620 = vmatpush3.bf16.xpose.msra.mxu0 %v492_v16  ;;  %1621 = vmatprep.mubr.msk.bf16.mxu0 %vm1802_vm0, %v1801_v2 }
 0x1cc   :  { %1631 = vmatprep.subr.bf16.mxu0 %v1801_v2 }
 0x1cd   :  { %v795_v26 = vpop.permute.xlu0 %794 }
 0x1ce   :  { %1616 = vmatmul.mubr.msk.bf16.vlgmr.msra.gmra.mxu1 %vm144_vm2, %v131_v17  ;;  %v800_v27 = vsel %vm633_vm3, %v795_v26, 0  ;;  %v737_v28 = vpop.permute.xlu1 %736 }
 0x1cf   :  { %1626 = vmatpush3.bf16.msra.mxu1 %v635_v18  ;;  %1627 = vmatprep.mubr.msk.bf16.mxu1 %vm1802_vm0, %v1801_v2 }
 0x1d0   :  { %1637 = vmatprep.subr.bf16.mxu1 %v1801_v2 }
 0x1d2   :  { %1622 = vmatmul.mubr.msk.bf16.vlgmr.msra.gmra.mxu0 %vm144_vm2, %v132_v22  ;;  %v792_v29 = vpop.permute.xlu1 %791 }
 0x1d3   :  { %1632 = vmatpush3.bf16.msra.mxu0 %v690_v23  ;;  %1633 = vmatprep.mubr.msk.bf16.mxu0 %vm1802_vm0, %v1801_v2 }
 0x1d4   :  { %1643 = vmatprep.subr.bf16.mxu0 %v1801_v2 }
 0x1d6   :  { %1628 = vmatmul.mubr.msk.bf16.vlgmr.msra.gmra.mxu1 %vm144_vm2, %v626_v20 }
 0x1d7   :  { %1638 = vmatpush3.bf16.msra.mxu1 %v745_v24  ;;  %1639 = vmatprep.mubr.msk.bf16.mxu1 %vm1802_vm0, %v1801_v2 }
 0x1d8   :  { %1649 = vmatprep.subr.bf16.mxu1 %v1801_v2 }
 0x1da   :  { %1634 = vmatmul.mubr.msk.bf16.vlgmr.msra.gmra.mxu0 %vm144_vm2, %v682_v25 }
 0x1db   :  { %1644 = vmatpush3.bf16.msra.mxu0 %v800_v27  ;;  %1645 = vmatprep.mubr.msk.bf16.mxu0 %vm1802_vm0, %v1801_v2 }
 0x1dc   :  { %1655 = vmatprep.subr.bf16.mxu0 %v1801_v2 }
 0x1de   :  { %1640 = vmatmul.mubr.msk.bf16.vlgmr.msra.gmra.mxu1 %vm144_vm2, %v737_v28 }
 0x1df   :  { %1651 = vmatprep.mubr.msk.bf16.mxu1 %vm1802_vm0, %v1801_v2 }
 0x1e2   :  { %1646 = vmatmul.mubr.msk.bf16.vlgmr.msra.gmra.mxu0 %vm144_vm2, %v792_v29 }
 0x1e3   :  { %1657 = vmatprep.mubr.msk.bf16.mxu0 %vm1802_vm0, %v1801_v2 }
 0x215   :  { %v1986_v30 = vpop.f32.mrf.mxu1  ;;  %v1988_v31 = vpop.f32.mrf.mxu0 }
 0x216   :  { %v537_v32 = vsel %vm144_vm2, %v1988_v31, -inf  ;;  %v534_v33 = vsel %vm144_vm2, %v1986_v30, -inf }
 0x217   :  { %538 = vmax.xlane.f32.xlu1 %v537_v32  ;;  %v1587_v34 = vpop.f32.mrf.mxu0  ;;  %535 = vmax.xlane.f32.xlu0 %v534_v33  ;;  %v1581_v35 = vpop.f32.mrf.mxu1 }
 0x219   :  { %v188_v36 = vpop.f32.mrf.mxu1  ;;  %v237_v37 = vpop.f32.mrf.mxu0 }
 0x21b   :  { %v1582_v38 = vpop.f32.mrf.mxu1  ;;  %v1588_v39 = vpop.f32.mrf.mxu0 }
 0x27e   :  { %v1994_v40 = vpop.f32.mrf.mxu1 }
 0x27f   :  { %v540_v41 = vsel %vm144_vm2, %v1994_v40, -inf }
 0x280   :  { %541 = vmax.xlane.f32.xlu0 %v540_v41  ;;  %v1593_v42 = vpop.f32.mrf.mxu1 }
 0x282   :  { %v286_v43 = vpop.f32.mrf.mxu1  ;;  %v1998_v44 = vpop.f32.mrf.mxu0 }
 0x283   :  { %v543_v45 = vsel %vm144_vm2, %v1998_v44, -inf }
 0x284   :  { %v1594_v46 = vpop.f32.mrf.mxu1  ;;  %v1599_v47 = vpop.f32.mrf.mxu0  ;;  %544 = vmax.xlane.f32.xlu0 %v543_v45 }
 0x286   :  { %v2002_v48 = vpop.f32.mrf.mxu1  ;;  %v335_v49 = vpop.f32.mrf.mxu0 }
 0x287   :  { %v546_v50 = vsel %vm144_vm2, %v2002_v48, -inf }
 0x288   :  { %547 = vmax.xlane.f32.xlu1 %v546_v50  ;;  %v1605_v51 = vpop.f32.mrf.mxu1  ;;  %v1600_v52 = vpop.f32.mrf.mxu0 }
 0x28a   :  { %v384_v53 = vpop.f32.mrf.mxu1  ;;  %v2006_v54 = vpop.f32.mrf.mxu0 }
 0x28b   :  { %v549_v55 = vsel %vm144_vm2, %v2006_v54, -inf }
 0x28c   :  { %v1606_v56 = vpop.f32.mrf.mxu1  ;;  %v1611_v57 = vpop.f32.mrf.mxu0  ;;  %550 = vmax.xlane.f32.xlu0 %v549_v55 }
 0x28e   :  { %v2010_v58 = vpop.f32.mrf.mxu1  ;;  %v433_v59 = vpop.f32.mrf.mxu0 }
 0x28f   :  { %v552_v60 = vsel %vm144_vm2, %v2010_v58, -inf }
 0x290   :  { %553 = vmax.xlane.f32.xlu1 %v552_v60  ;;  %v1617_v61 = vpop.f32.mrf.mxu1  ;;  %v1612_v62 = vpop.f32.mrf.mxu0 }
 0x292   :  { %v482_v63 = vpop.f32.mrf.mxu1  ;;  %v2014_v0 = vpop.f32.mrf.mxu0 }
 0x293   :  { %v555_v1 = vsel %vm144_vm2, %v2014_v0, -inf }
 0x294   :  { %v1618_v3 = vpop.f32.mrf.mxu1  ;;  %v1623_v4 = vpop.f32.mrf.mxu0  ;;  %556 = vmax.xlane.f32.xlu0 %v555_v1 }
 0x296   :  { %v671_v5 = vpop.f32.mrf.mxu1  ;;  %v531_v8 = vpop.f32.mrf.mxu0 }
 0x297   :  { %v843_v9 = vpack.c.bf16 %v671_v5, %v671_v5 }
 0x298   :  { %v1629_v10 = vpop.f32.mrf.mxu1  ;;  %v1624_v15 = vpop.f32.mrf.mxu0 }
 0x299   :  { %v863_v14 = vsel %vm633_vm3, %v843_v9, 0 }
 0x29a   :  { %v674_v16 = vpop.f32.mrf.mxu1  ;;  %1650 = vmatpush3.bf16.msra.mxu1 %v863_v14  ;;  %v2019_v18 = vpop.f32.mrf.mxu0 }
 0x29b   :  { %v844_v17 = vpack.c.bf16 %v674_v16, %v674_v16  ;;  %1661 = vmatprep.subr.bf16.mxu1 %v1801_v2 }
 0x29c   :  { %v1630_v19 = vpop.f32.mrf.mxu1  ;;  %v1635_v21 = vpop.f32.mrf.mxu0 }
 0x29d   :  { %v909_v20 = vsel %vm633_vm3, %v844_v17, 0  ;;  %v845_v21 = vpack.c.bf16 %v2019_v18, %v2019_v18 }
 0x29e   :  { %v2023_v22 = vpop.f32.mrf.mxu1  ;;  %1656 = vmatpush3.bf16.msra.mxu0 %v909_v20  ;;  %v2025_v23 = vpop.f32.mrf.mxu0 }
 0x29f   :  { %1667 = vmatprep.subr.bf16.mxu0 %v1801_v2  ;;  %v846_v19 = vpack.c.bf16 %v2025_v23, %v2025_v23 }
 0x2a0   :  { %v539_v24 = vpop.xlane.xlu1 %538  ;;  %v536_v25 = vpop.xlane.xlu0 %535 }
 0x2a1   :  { %v559_v26 = vsub.f32 %v1988_v31, %v539_v24  ;;  %v1636_v27 = vpop.f32.mrf.mxu0  ;;  %v558_v28 = vsub.f32 %v1986_v30, %v536_v25  ;;  %v1641_v29 = vpop.f32.mrf.mxu1 }
 0x2a2   :  { %v1001_v27 = vsel %vm633_vm3, %v846_v19, 0 }
 0x2a3   :  { %v568_v32 = vmul.f32 1.442695, %v559_v26  ;;  %v566_v33 = vmul.f32 1.442695, %v558_v28  ;;  %v2030_v34 = vpop.f32.mrf.mxu1  ;;  %v2032_v35 = vpop.f32.mrf.mxu0  ;;  %v955_v28 = vsel %vm633_vm3, %v845_v21, 0  ;;  %v1243_v21 = vsub.s32 1, %v1875_v11 }
 0x2a5   :  { %1739 = vpow2.f32 %v568_v32  ;;  %v1642_v36 = vpop.f32.mrf.mxu1  ;;  %v1647_v37 = vpop.f32.mrf.mxu0 }
 0x2a6   :  { %1741 = vpow2.f32 %v566_v33  ;;  %v847_v36 = vpack.c.bf16 %v2023_v22, %v2023_v22 }
 0x2a7   :  { %v2034_v38 = vpop.f32.mrf.mxu0 }
 0x2a9   :  { %v1648_v39 = vpop.f32.mrf.mxu0 }
 0x2b2   :  { %v1740_v41 = vpop.eup %1739 }
 0x2b3   :  { %v1742_v42 = vpop.eup %1741  ;;  %v585_v31 = vsel %vm144_vm2, %v1740_v41, 0.0 }
 0x2b4   :  { %586 = vadd.xlane.f32.xlu0 %v585_v31  ;;  %v582_v30 = vsel %vm144_vm2, %v1742_v42, 0.0  ;;  %v1047_v31 = vsel %vm633_vm3, %v847_v36, 0 }
 0x2b5   :  { %583 = vadd.xlane.f32.xlu1 %v582_v30  ;;  %v848_v30 = vpack.c.bf16 %v2030_v34, %v2030_v34 }
 0x309   :  { %v542_v43 = vpop.xlane.xlu0 %541 }
 0x30a   :  { %v560_v45 = vsub.f32 %v1994_v40, %v542_v43 }
 0x30c   :  { %v570_v46 = vmul.f32 1.442695, %v560_v45 }
 0x30d   :  { %v545_v47 = vpop.xlane.xlu0 %544 }
 0x30e   :  { %1743 = vpow2.f32 %v570_v46  ;;  %v561_v49 = vsub.f32 %v1998_v44, %v545_v47  ;;  %v849_v47 = vpack.c.bf16 %v2032_v35, %v2032_v35  ;;  %v850_v35 = vpack.c.bf16 %v2034_v38, %v2034_v38 }
 0x310   :  { %v572_v50 = vmul.f32 1.442695, %v561_v49 }
 0x311   :  { %v548_v51 = vpop.xlane.xlu1 %547 }
 0x312   :  { %v562_v52 = vsub.f32 %v2002_v48, %v548_v51  ;;  %1745 = vpow2.f32 %v572_v50  ;;  %v1093_v50 = vsel %vm633_vm3, %v848_v30, 0 }
 0x314   :  { %v574_v53 = vmul.f32 1.442695, %v562_v52  ;;  %v1139_v52 = vsel %vm633_vm3, %v849_v47, 0 }
 0x315   :  { %v551_v55 = vpop.xlane.xlu0 %550 }
 0x316   :  { %1747 = vpow2.f32 %v574_v53  ;;  %v563_v56 = vsub.f32 %v2006_v54, %v551_v55 }
 0x318   :  { %v576_v57 = vmul.f32 1.442695, %v563_v56 }
 0x319   :  { %v554_v59 = vpop.xlane.xlu1 %553 }
 0x31a   :  { %v564_v60 = vsub.f32 %v2010_v58, %v554_v59  ;;  %1749 = vpow2.f32 %v576_v57  ;;  %v1185_v59 = vsel %vm633_vm3, %v850_v35, 0 }
 0x31b   :  { %v1744_v40 = vpop.eup %1743 }
 0x31c   :  { %v578_v61 = vmul.f32 1.442695, %v564_v60  ;;  %v588_v62 = vsel %vm144_vm2, %v1744_v40, 0.0 }
 0x31d   :  { %589 = vadd.xlane.f32.xlu1 %v588_v62  ;;  %v557_v44 = vpop.xlane.xlu0 %556 }
 0x31e   :  { %1751 = vpow2.f32 %v578_v61  ;;  %v565_v48 = vsub.f32 %v2014_v0, %v557_v44 }
 0x31f   :  { %v1746_v63 = vpop.eup %1745 }
 0x320   :  { %v580_v1 = vmul.f32 1.442695, %v565_v48  ;;  %v591_v3 = vsel %vm144_vm2, %v1746_v63, 0.0 }
 0x321   :  { %592 = vadd.xlane.f32.xlu0 %v591_v3 }
 0x322   :  { %1753 = vpow2.f32 %v580_v1 }
 0x323   :  { %v1748_v54 = vpop.eup %1747 }
 0x324   :  { %v594_v4 = vsel %vm144_vm2, %v1748_v54, 0.0 }
 0x325   :  { %595 = vadd.xlane.f32.xlu1 %v594_v4 }
 0x327   :  { %v2047_v58 = vpop.eup %1749 }
 0x328   :  { %v597_v5 = vsel %vm144_vm2, %v2047_v58, 0.0 }
 0x329   :  { %598 = vadd.xlane.f32.xlu0 %v597_v5 }
 0x32b   :  { %v2051_v8 = vpop.eup %1751 }
 0x32c   :  { %v600_v0 = vsel %vm144_vm2, %v2051_v8, 0.0 }
 0x32d   :  { %601 = vadd.xlane.f32.xlu1 %v600_v0 }
 0x32f   :  { %v2055_v9 = vpop.eup %1753 }
 0x330   :  { %v603_v10 = vsel %vm144_vm2, %v2055_v9, 0.0 }
 0x331   :  { %604 = vadd.xlane.f32.xlu0 %v603_v10 }
 0x33d   :  { %v587_v14 = vpop.xlane.xlu0 %586 }
 0x33e   :  { %1755 = vrcp.f32 %v587_v14  ;;  %v584_v15 = vpop.xlane.xlu1 %583 }
 0x33f   :  { %1757 = vrcp.f32 %v584_v15 }
 0x34b   :  { %v1756_v16 = vpop.eup %1755 }
 0x34c   :  { %v1758_v17 = vpop.eup %1757  ;;  %v615_v20 = vmul.f32 %v1756_v16, %v1740_v41 }
 0x34d   :  { %v614_v24 = vmul.f32 %v1758_v17, %v1742_v42 }
 0x34e   :  { %v852_v25 = vpack.c.bf16 %v615_v20, %v615_v20 }
 0x34f   :  { %v851_v26 = vpack.c.bf16 %v614_v24, %v614_v24 }
 0x350   :  { %1658 = vmatmul.mubr.msk.bf16.vlgmr.msra.gmra.mxu0 %vm144_vm2, %v852_v25 }
 0x351   :  { %1652 = vmatmul.mubr.msk.bf16.vlgmr.msra.gmra.mxu1 %vm144_vm2, %v851_v26  ;;  %1668 = vmatpush3.bf16.msra.mxu0 %v1001_v27 }
 0x352   :  { %1662 = vmatpush3.bf16.msra.mxu1 %v955_v28  ;;  %1663 = vmatprep.mubr.msk.bf16.mxu1 %vm1802_vm0, %v1801_v2 }
 0x353   :  { %1673 = vmatprep.subr.bf16.mxu1 %v1801_v2  ;;  %1669 = vmatprep.mubr.msk.bf16.mxu0 %vm1802_vm0, %v1801_v2 }
 0x354   :  { %1679 = vmatprep.subr.bf16.mxu0 %v1801_v2 }
 0x3a6   :  { %v590_v18 = vpop.xlane.xlu1 %589 }
 0x3a7   :  { %1759 = vrcp.f32 %v590_v18 }
 0x3aa   :  { %v593_v23 = vpop.xlane.xlu0 %592 }
 0x3ab   :  { %1761 = vrcp.f32 %v593_v23 }
 0x3ae   :  { %v596_v29 = vpop.xlane.xlu1 %595 }
 0x3af   :  { %1763 = vrcp.f32 %v596_v29 }
 0x3b2   :  { %v599_v32 = vpop.xlane.xlu0 %598 }
 0x3b3   :  { %1765 = vrcp.f32 %v599_v32 }
 0x3b4   :  { %v1760_v33 = vpop.eup %1759 }
 0x3b5   :  { %v616_v37 = vmul.f32 %v1760_v33, %v1744_v40  ;;  %v1244_v33 = vrot.slane %v29_v13, %v1243_v21 }
 0x3b6   :  { %v602_v39 = vpop.xlane.xlu1 %601 }
 0x3b7   :  { %1767 = vrcp.f32 %v602_v39  ;;  %v853_v41 = vpack.c.bf16 %v616_v37, %v616_v37 }
 0x3b8   :  { %v1762_v42 = vpop.eup %1761 }
 0x3b9   :  { %1664 = vmatmul.mubr.msk.bf16.vlgmr.msra.gmra.mxu1 %vm144_vm2, %v853_v41  ;;  %v617_v43 = vmul.f32 %v1762_v42, %v1746_v63 }
 0x3ba   :  { %1674 = vmatpush3.bf16.msra.mxu1 %v1047_v31  ;;  %1675 = vmatprep.mubr.msk.bf16.mxu1 %vm1802_vm0, %v1801_v2  ;;  %v605_v45 = vpop.xlane.xlu0 %604 }
 0x3bb   :  { %1685 = vmatprep.subr.bf16.mxu1 %v1801_v2  ;;  %1769 = vrcp.f32 %v605_v45  ;;  %v854_v46 = vpack.c.bf16 %v617_v43, %v617_v43 }
 0x3bc   :  { %v1764_v22 = vpop.eup %1763 }
 0x3bd   :  { %v618_v49 = vmul.f32 %v1764_v22, %v1748_v54  ;;  %1670 = vmatmul.mubr.msk.bf16.vlgmr.msra.gmra.mxu0 %vm144_vm2, %v854_v46 }
 0x3be   :  { %1680 = vmatpush3.bf16.msra.mxu0 %v1093_v50  ;;  %1681 = vmatprep.mubr.msk.bf16.mxu0 %vm1802_vm0, %v1801_v2 }
 0x3bf   :  { %v855_v34 = vpack.c.bf16 %v618_v49, %v618_v49  ;;  %1691 = vmatprep.subr.bf16.mxu0 %v1801_v2 }
 0x3c0   :  { %v1766_v51 = vpop.eup %1765 }
 0x3c1   :  { %1676 = vmatmul.mubr.msk.bf16.vlgmr.msra.gmra.mxu1 %vm144_vm2, %v855_v34  ;;  %v619_v53 = vmul.f32 %v1766_v51, %v2047_v58 }
 0x3c2   :  { %1686 = vmatpush3.bf16.msra.mxu1 %v1139_v52  ;;  %1687 = vmatprep.mubr.msk.bf16.mxu1 %vm1802_vm0, %v1801_v2 }
 0x3c3   :  { %1697 = vmatprep.subr.bf16.mxu1 %v1801_v2  ;;  %v856_v56 = vpack.c.bf16 %v619_v53, %v619_v53 }
 0x3c4   :  { %v1768_v55 = vpop.eup %1767 }
 0x3c5   :  { %v620_v57 = vmul.f32 %v1768_v55, %v2051_v8  ;;  %1682 = vmatmul.mubr.msk.bf16.vlgmr.msra.gmra.mxu0 %vm144_vm2, %v856_v56 }
 0x3c6   :  { %1692 = vmatpush3.bf16.msra.mxu0 %v1185_v59  ;;  %1693 = vmatprep.mubr.msk.bf16.mxu0 %vm1802_vm0, %v1801_v2 }
 0x3c7   :  { %v857_v60 = vpack.c.bf16 %v620_v57, %v620_v57  ;;  %1705 = vmatprep.subr.bf16.mxu0 %v1801_v2 }
 0x3c8   :  { %v1770_v38 = vpop.eup %1769 }
 0x3c9   :  { %1688 = vmatmul.mubr.msk.bf16.vlgmr.msra.gmra.mxu1 %vm144_vm2, %v857_v60  ;;  %v621_v40 = vmul.f32 %v1770_v38, %v2055_v9 }
 0x3ca   :  { %1701 = vmatprep.mubr.msk.bf16.mxu1 %vm1802_vm0, %v1801_v2 }
 0x3cb   :  { %v858_v61 = vpack.c.bf16 %v621_v40, %v621_v40 }
 0x3cd   :  { %1694 = vmatmul.mubr.msk.bf16.vlgmr.msra.gmra.mxu0 %vm144_vm2, %v858_v61 }
 0x3ce   :  { %1713 = vmatprep.mubr.msk.bf16.mxu0 %vm1802_vm0, %v1801_v2 }
 0x410   :  { %v945_v62 = vpop.f32.mrf.mxu0 }
 0x411   :  { %v899_v44 = vpop.f32.mrf.mxu1  ;;  %v1234_v39 = vsel %vm52_vm1, %v945_v62, 0.0 }
 0x412   :  { %v1659_v48 = vpop.f32.mrf.mxu0  ;;  %v1227_v24 = vsel %vm52_vm1, %v899_v44, 0.0 }
 0x413   :  { %v1653_v63 = vpop.f32.mrf.mxu1 }
 0x414   :  { %v948_v1 = vpop.f32.mrf.mxu0  ;;  %v1736_v63 = vld [vmem:[%s2169_s1 + $0x10] sm:$0xff]  }
 0x415   :  { %v902_v3 = vpop.f32.mrf.mxu1  ;;  %v1737_v1 = vld [vmem:[%s2169_s1 + $0x28] sm:$0xff]  }
 0x416   :  { %v1660_v54 = vpop.f32.mrf.mxu0  ;;  %1706 = vmatpush3.bf16.msra.mxu0 %v1737_v1 }
 0x417   :  { %v1654_v4 = vpop.f32.mrf.mxu1  ;;  %1707 = vmatprep.subr.bf16.mxu0 %v1801_v2 }
 0x479   :  { %v991_v58 = vpop.f32.mrf.mxu1 }
 0x47a   :  { %v1228_v17 = vsel %vm52_vm1, %v991_v58, 0.0 }
 0x47b   :  { %v1665_v5 = vpop.f32.mrf.mxu1  ;;  %v1229_v27 = vadd.f32 %v1228_v17, %v1227_v24 }
 0x47d   :  { %v994_v8 = vpop.f32.mrf.mxu1  ;;  %v1037_v0 = vpop.f32.mrf.mxu0 }
 0x47e   :  { %v1235_v23 = vsel %vm52_vm1, %v1037_v0, 0.0 }
 0x47f   :  { %v1666_v9 = vpop.f32.mrf.mxu1  ;;  %v1671_v10 = vpop.f32.mrf.mxu0  ;;  %v1236_v30 = vadd.f32 %v1235_v23, %v1234_v39 }
 0x480   :  { %v32_v10 = vld [vmem:[%s2169_s1 + $0x30] sm:$0x4] }
 0x481   :  { %v1083_v14 = vpop.f32.mrf.mxu1  ;;  %v1040_v15 = vpop.f32.mrf.mxu0 }
 0x482   :  { %v1230_v25 = vsel %vm52_vm1, %v1083_v14, 0.0  ;;  %v33_v14 = vunpack.c.l.bf16 %v32_v10  ;;  %v1278_v15 = vsub.s32 4, %v1875_v11 }
 0x483   :  { %v1677_v16 = vpop.f32.mrf.mxu1  ;;  %v1672_v19 = vpop.f32.mrf.mxu0  ;;  %v1231_v29 = vadd.f32 %v1230_v25, %v1229_v27 }
 0x484   :  { %v1279_v19 = vrot.slane %v33_v14, %v1278_v15 }
 0x485   :  { %v1086_v20 = vpop.f32.mrf.mxu1  ;;  %v1129_v26 = vpop.f32.mrf.mxu0 }
 0x486   :  { %v1237_v41 = vsel %vm52_vm1, %v1129_v26, 0.0  ;;  %v1284_v20 = vsub.s32 5, %v1875_v11 }
 0x487   :  { %v1678_v28 = vpop.f32.mrf.mxu1  ;;  %v1683_v18 = vpop.f32.mrf.mxu0  ;;  %v1238_v46 = vadd.f32 %v1237_v41, %v1236_v30 }
 0x488   :  { %v1285_v26 = vrot.slane %v33_v14, %v1284_v20 }
 0x489   :  { %v1175_v32 = vpop.f32.mrf.mxu1  ;;  %v1132_v36 = vpop.f32.mrf.mxu0 }
 0x48a   :  { %v1232_v37 = vsel %vm52_vm1, %v1175_v32, 0.0  ;;  %v30_v32 = vld [vmem:[%s2169_s1 + $0x30] sm:$0x2]  ;;  %v1291_v36 = vsub.s32 2, %v1875_v11 }
 0x48b   :  { %v1233_v42 = vadd.f32 %v1232_v37, %v1231_v29  ;;  %v1689_v31 = vpop.f32.mrf.mxu1  ;;  %v1684_v43 = vpop.f32.mrf.mxu0  ;;  %v1738_v29 = vld [vmem:[%s2169_s1 + $0x20] sm:$0xff]  }
 0x48c   :  { %1708 = vmatpush3.bf16.msra.mxu0 %v1738_v29 }
 0x48d   :  { %v1245_v45 = vadd.f32 %v1244_v33, %v1233_v42  ;;  %v1178_v22 = vpop.f32.mrf.mxu1  ;;  %v1221_v47 = vpop.f32.mrf.mxu0  ;;  %1709 = vmatprep.subr.bf16.mxu0 %v1801_v2 }
 0x48e   :  { %v1239_v49 = vsel %vm52_vm1, %v1221_v47, 0.0 }
 0x48f   :  { %v1690_v50 = vpop.f32.mrf.mxu1  ;;  %v1247_v12 = vadd.f32 %v1245_v45, %v1856_v6  ;;  %v1240_v13 = vadd.f32 %v1239_v49, %v1238_v46  ;;  %v1695_v34 = vpop.f32.mrf.mxu0 }
 0x491   :  { %v1249_v51 = vsel %vm52_vm1, %v1247_v12, 0.0  ;;  %v1246_v52 = vadd.f32 %v1244_v33, %v1240_v13  ;;  %v1224_v35 = vpop.f32.mrf.mxu0  ;;  %v31_v33 = vunpack.c.l.bf16 %v30_v32 }
 0x492   :  { %1250 = vadd.xlane.f32.xlu1 %v1249_v51 }
 0x493   :  { %v1696_v53 = vpop.f32.mrf.mxu0  ;;  %v1248_v55 = vadd.f32 %v1246_v52, %v1861_v7  ;;  %v1735_v7 = vld [vmem:[%s2169_s1 + $0x18] sm:$0xff]   ;;  %v1292_v37 = vrot.slane %v31_v33, %v1291_v36 }
 0x494   :  { %1710 = vmatpush3.bf16.msra.mxu0 %v1735_v7 }
 0x495   :  { %v1252_v56 = vsel %vm52_vm1, %v1248_v55, 0.0  ;;  %1711 = vmatprep.subr.bf16.mxu0 %v1801_v2 }
 0x496   :  { %1253 = vadd.xlane.f32.xlu0 %v1252_v56 }
 0x498   :  { %1712 = vmatpush3.bf16.msra.mxu0 %v1736_v63 }
 0x51b   :  { %v1251_v57 = vpop.xlane.xlu1 %1250 }
 0x51c   :  { %v1256_v59 = vmul.f32 0.03125, %v1251_v57 }
 0x51e   :  { %v1258_v60 = vsub.f32 %v1247_v12, %v1256_v59 }
 0x51f   :  { %v1254_v38 = vpop.xlane.xlu0 %1253 }
 0x520   :  { %v1260_v40 = vmul.f32 %v1258_v60, %v1258_v60  ;;  %v1257_v61 = vmul.f32 0.03125, %v1254_v38 }
 0x522   :  { %v1262_v6 = vsel %vm52_vm1, %v1260_v40, 0.0  ;;  %v1259_v62 = vsub.f32 %v1248_v55, %v1257_v61 }
 0x523   :  { %1263 = vadd.xlane.f32.xlu1 %v1262_v6 }
 0x524   :  { %v1261_v44 = vmul.f32 %v1259_v62, %v1259_v62 }
 0x526   :  { %v1265_v48 = vsel %vm52_vm1, %v1261_v44, 0.0 }
 0x527   :  { %1266 = vadd.xlane.f32.xlu0 %v1265_v48 }
 0x534   :  { %1305 = vrot.lane.b32.xlu1 %v1735_v7, %s1809_s30 }
 0x53d   :  { %1303 = vrot.lane.b32.xlu0 %v1736_v63, %s1809_s30 }
 0x5ac   :  { %v1264_v3 = vpop.xlane.xlu1 %1263 }
 0x5ad   :  { %v1268_v54 = vmul.f32 0.03125, %v1264_v3 }
 0x5af   :  { %v1270_v4 = vadd.f32 1e-05, %v1268_v54 }
 0x5b0   :  { %v1306_v58 = vpop.permute.xlu1 %1305  ;;  %v1267_v5 = vpop.xlane.xlu0 %1266 }
 0x5b1   :  { %1771 = vrsqrt.f32 %v1270_v4  ;;  %1698 = vmatpush3.bf16.msra.mxu1 %v1306_v58  ;;  %v1269_v8 = vmul.f32 0.03125, %v1267_v5  ;;  %v34_v4 = vld [vmem:[%s2169_s1 + $0x30] sm:$0x8]  ;;  %v1449_v5 = vsub.s32 6, %v1875_v11  ;;  %s1779_s1 = scalar_lea.vmem %s1467_s16, 256 }
 0x5b2   :  { %1699 = vmatprep.subr.bf16.mxu1 %v1801_v2  ;;  %v1358_v2 = vsub.s32 3, %v1875_v11  ;;  %v35_v58 = vunpack.c.l.bf16 %v34_v4  ;;  %p1780_p0 = scmp.ne.s32.totalorder %s1467_s16, %s1779_s1  ;;  %p1785_p2 = scmp.lt.s32.totalorder %s1779_s1, %s1779_s1 }
 0x5b3   :  { %v1271_v0 = vadd.f32 1e-05, %v1269_v8  ;;  %v1455_v8 = vsub.s32 7, %v1875_v11 }
 0x5b4   :  { %v1304_v9 = vpop.permute.xlu0 %1303  ;;  %v1359_v47 = vrot.slane %v31_v33, %v1358_v2  ;;  %p1786_p3 = por %p1785_p2, %p1784_p1 }
 0x5b5   :  { %1773 = vrsqrt.f32 %v1271_v0  ;;  %1700 = vmatpush3.bf16.msra.mxu1 %v1304_v9  ;;  %v1450_v0 = vrot.slane %v35_v58, %v1449_v5  ;;  %v1456_v14 = vrot.slane %v35_v58, %v1455_v8 }
 0x5b6   :  { %p1787_p4 = pnand %p1786_p3, %p1780_p0 }
 0x5be   :  { %v1772_v16 = vpop.eup %1771 }
 0x5bf   :  { %v1274_v17 = vmul.f32 %v1772_v16, %v1258_v60 }
 0x5c1   :  { %v1280_v25 = vmul.f32 %v1279_v19, %v1274_v17 }
 0x5c2   :  { %v1774_v21 = vpop.eup %1773 }
 0x5c3   :  { %v1275_v24 = vmul.f32 %v1774_v21, %v1259_v62  ;;  %v1286_v28 = vadd.f32 %v1285_v26, %v1280_v25 }
 0x5c5   :  { %v1281_v27 = vmul.f32 %v1279_v19, %v1275_v24 }
 0x5c7   :  { %v1287_v18 = vadd.f32 %v1285_v26, %v1281_v27 }
 0x5c9   :  { %v1288_v23 = vpack.c.bf16 %v1287_v18, %v1286_v28 }
 0x5cb   :  { %1702 = vmatmul.mubr.msk.bf16.vlgmr.msra.gmra.mxu1 %vm52_vm1, %v1288_v23 }
 0x68b   :  { %v1346_v39 = vpop.f32.mrf.mxu1 }
 0x68c   :  { %v1347_v42 = vadd.f32 %v1346_v39, %v1292_v37 }
 0x68d   :  { %v1703_v41 = vpop.f32.mrf.mxu1 }
 0x68e   :  { %v1353_v45 = vmax.f32 %v1347_v42, 0.0 }
 0x68f   :  { %v1349_v31 = vpop.f32.mrf.mxu1 }
 0x690   :  { %v1350_v30 = vadd.f32 %v1349_v31, %v1292_v37 }
 0x691   :  { %v1704_v43 = vpop.f32.mrf.mxu1 }
 0x692   :  { %v1354_v22 = vmax.f32 %v1350_v30, 0.0 }
 0x694   :  { %v1355_v46 = vpack.c.bf16 %v1354_v22, %v1353_v45 }
 0x696   :  { %1714 = vmatmul.mubr.msk.bf16.vlgmr.msra.gmra.mxu0 %vm1374_vm4, %v1355_v46 }
 0x756   :  { %v1412_v49 = vpop.f32.mrf.mxu0 }
 0x757   :  { %v1413_v50 = vadd.f32 %v1412_v49, %v1359_v47 }
 0x758   :  { %v1715_v12 = vpop.f32.mrf.mxu0 }
 0x759   :  { %v1419_v13 = vadd.f32 %v1413_v50, %v1286_v28 }
 0x75a   :  { %v1415_v34 = vpop.f32.mrf.mxu0 }
 0x75b   :  { %v1416_v51 = vadd.f32 %v1415_v34, %v1359_v47  ;;  %v1421_v52 = vsel %vm52_vm1, %v1419_v13, 0.0 }
 0x75c   :  { %1422 = vadd.xlane.f32.xlu1 %v1421_v52  ;;  %v1716_v35 = vpop.f32.mrf.mxu0 }
 0x75d   :  { %v1420_v53 = vadd.f32 %v1416_v51, %v1287_v18 }
 0x75f   :  { %v1424_v55 = vsel %vm52_vm1, %v1420_v53, 0.0 }
 0x760   :  { %1425 = vadd.xlane.f32.xlu0 %v1424_v55 }
 0x7e5   :  { %v1423_v56 = vpop.xlane.xlu1 %1422 }
 0x7e6   :  { %v1427_v57 = vmul.f32 0.03125, %v1423_v56 }
 0x7e8   :  { %v1429_v59 = vsub.f32 %v1419_v13, %v1427_v57 }
 0x7e9   :  { %v1426_v60 = vpop.xlane.xlu0 %1425 }
 0x7ea   :  { %v1428_v38 = vmul.f32 0.03125, %v1426_v60  ;;  %v1431_v40 = vmul.f32 %v1429_v59, %v1429_v59 }
 0x7ec   :  { %v1430_v61 = vsub.f32 %v1420_v53, %v1428_v38  ;;  %v1433_v6 = vsel %vm52_vm1, %v1431_v40, 0.0 }
 0x7ed   :  { %1434 = vadd.xlane.f32.xlu1 %v1433_v6 }
 0x7ee   :  { %v1432_v62 = vmul.f32 %v1430_v61, %v1430_v61 }
 0x7f0   :  { %v1436_v44 = vsel %vm52_vm1, %v1432_v62, 0.0 }
 0x7f1   :  { %1437 = vadd.xlane.f32.xlu0 %v1436_v44 }
 0x876   :  { %v1435_v48 = vpop.xlane.xlu1 %1434 }
 0x877   :  { %v1439_v7 = vmul.f32 0.03125, %v1435_v48 }
 0x879   :  { %v1441_v63 = vadd.f32 1e-05, %v1439_v7 }
 0x87a   :  { %v1438_v1 = vpop.xlane.xlu0 %1437 }
 0x87b   :  { %1775 = vrsqrt.f32 %v1441_v63  ;;  %v1440_v3 = vmul.f32 0.03125, %v1438_v1 }
 0x87d   :  { %v1442_v54 = vadd.f32 1e-05, %v1440_v3 }
 0x87f   :  { %1777 = vrsqrt.f32 %v1442_v54 }
 0x888   :  { %v1776_v9 = vpop.eup %1775 }
 0x889   :  { %v1445_v10 = vmul.f32 %v1776_v9, %v1429_v59 }
 0x88b   :  { %v1451_v15 = vmul.f32 %v1450_v0, %v1445_v10 }
 0x88c   :  { %v1778_v16 = vpop.eup %1777 }
 0x88d   :  { %v1446_v17 = vmul.f32 %v1778_v16, %v1430_v61  ;;  %v1457_v19 = vadd.f32 %v1456_v14, %v1451_v15 }
 0x88f   :  { %v1452_v20 = vmul.f32 %v1450_v0, %v1446_v17  ;;  %1459 = vst.msk [vmem:[#allocation2] sm:$0xff] %vm52_vm1, %v1457_v19 }
 0x891   :  { %v1458_v21 = vadd.f32 %v1456_v14, %v1452_v20 }
 0x893   :  { %1460 = vst.msk [vmem:[#allocation2 + $0x8] sm:$0xff] %vm52_vm1, %v1458_v21 }
 0x894   :  { %1790 = shalt.err (!%p1787_p4)
}
 0x895   :  { %s1811_s17 = smov 128   ;;  %s1812_s18 = smov 8  }
 0x896   :  { %1472 = dma.vmem_to_hbm [thread:$0]  %s1467_s16, 256, %s2170_s2, [#allocation3], %s1811_s17, %s1811_s17, %s1812_s18  }
 0x897   :  { %1799 = dma.done.wait [#allocation3], 256  }
 0x898   :  { %1800 = vsyncadd [#allocation3], 4294967040 }
 0x899   :  { %1476 = vsyncpa [#allocation3], 1 }

</bundles_post_ra>
